<compile_context>
chip_gen: v6e
topology: v6e:2x2x1
jax: 0.10.0
libtpu: 0.0.40
codegen_flags: <defaults>
</compile_context>

<pallas_src>
import functools

import jax
import jax.numpy as jnp
from jax.experimental import pallas as pl
from jax.experimental.pallas import tpu as pltpu

HID = 64     # width of each branch layer
HID0 = 128   # concat([h_s, h_a]) width (64 + 64)
HID1 = 32    # shared hidden width
LANE = 128   # lane-dense padded width for hidden activations / packed weights


def _round_up(x, m):
    return (x + m - 1) // m * m


def critic_kernel(s_ref, a_ref, ws_ref, wa_ref, w1_ref, w2_ref, b01_ref, b2_ref,
                  out_ref):
    """One batch tile of the full critic forward.

    s_ref   : (TB, in_dim)    state tile
    a_ref   : (TB, act_dim)   action tile
    ws_ref  : (in_dim, 128)   [Ws | 0]
    wa_ref  : (act_dim, 128)  [0 | Wa]
    w1_ref  : (128, 128)      cols [0,32) = W1, rest exactly 0
    w2_ref  : (128, out_dim)  rows [0,32) = W2, rest exactly 0
    b01_ref : (2, 128)        row0 = [bs | ba], row1 = b1 zero-padded
    b2_ref  : (1, out_dim)    b2
    out_ref : (TB, out_dim)   exact-shape output tile
    """
    # layer 0: fused state/action branches. Block structure keeps them exact:
    #   relu(s@[Ws|0] + a@[0|Wa] + [bs|ba]) == [relu(s@Ws+bs) | relu(a@Wa+ba)]
    h = jnp.dot(s_ref[...], ws_ref[...], preferred_element_type=jnp.float32)
    h = h + jnp.dot(a_ref[...], wa_ref[...], preferred_element_type=jnp.float32)
    h = jnp.maximum(h + b01_ref[0:1, :], 0.0)

    # shared layer 1: relu(h @ W1 + b1)   (cols >= 32 stay exactly 0)
    h1 = jnp.dot(h, w1_ref[...], preferred_element_type=jnp.float32) + b01_ref[1:2, :]
    h1 = jnp.maximum(h1, 0.0)

    # shared layer 2 (no activation), exact out_dim-wide store
    out = jnp.dot(h1, w2_ref[...], preferred_element_type=jnp.float32) + b2_ref[...]
    out_ref[...] = out.astype(out_ref.dtype)


def init_params(key, input_dim, output_dim):
    """Deterministic init mimicking nn.Linear default (uniform +-1/sqrt(fan_in))."""
    def linear(key, fan_in, fan_out):
        kw, kb = jax.random.split(key)
        bound = 1.0 / jnp.sqrt(fan_in)
        w = jax.random.uniform(kw, (fan_in, fan_out), jnp.float32, -bound, bound)
        b = jax.random.uniform(kb, (fan_out,), jnp.float32, -bound, bound)
        return w, b

    k1, k2, k3, k4 = jax.random.split(key, 4)
    ws, bs = linear(k1, input_dim, HID)      # state_layer
    wa, ba = linear(k2, output_dim, HID)     # action_layer
    w1, b1 = linear(k3, HID0, HID1)          # shared_layers[0]
    w2, b2 = linear(k4, HID1, output_dim)    # shared_layers[2]
    return {"ws": ws, "bs": bs, "wa": wa, "ba": ba,
            "w1": w1, "b1": b1, "w2": w2, "b2": b2}


def pack_params(p, input_dim, output_dim):
    """Pack raw tensors into a few lane-padded kernel arrays (DMA'd once)."""
    ws_p = jnp.zeros((input_dim, LANE), jnp.float32).at[:, :HID].set(p["ws"])
    wa_p = jnp.zeros((output_dim, LANE), jnp.float32).at[:, HID:].set(p["wa"])
    w1_p = jnp.zeros((LANE, LANE), jnp.float32).at[:, :HID1].set(p["w1"])
    w2_p = jnp.zeros((LANE, output_dim), jnp.float32).at[:HID1, :].set(p["w2"])

    b01 = jnp.zeros((2, LANE), jnp.float32)
    b01 = b01.at[0, :HID].set(p["bs"])
    b01 = b01.at[0, HID:].set(p["ba"])
    b01 = b01.at[1, :HID1].set(p["b1"])
    b2 = p["b2"].reshape(1, output_dim).astype(jnp.float32)

    return {"ws": ws_p, "wa": wa_p, "w1": w1_p, "w2": w2_p, "b01": b01, "b2": b2}


@functools.partial(jax.jit, static_argnames=("tb",))
def critic_forward(state, action, packed, *, tb=4096):
    """Full critic forward: batch-gridded, weights VMEM-resident, exact output."""
    B, in_dim = state.shape
    act_dim = action.shape[1]
    out_dim = packed["w2"].shape[1]

    state = state.astype(jnp.float32)
    action = action.astype(jnp.float32)

    # Only copy/pad when the batch is not a sublane multiple (rare). Otherwise
    # the grid's partial tail block covers B % tile with no extra HBM pass.
    b_eff = _round_up(max(B, 8), 8)
    if b_eff != B:
        state = jnp.pad(state, ((0, b_eff - B), (0, 0)))
        action = jnp.pad(action, ((0, b_eff - B), (0, 0)))

    # Batch tile: multiple of 128 rows, capped at ~ceil(B/2) so any sizeable
    # batch gives >= 2 grid steps (both v7x TensorCores busy), capped at tb and
    # at a VMEM budget (double-buffered activation tiles << scoped VMEM).
    row_bytes = 4 * (in_dim + act_dim + out_dim)
    vmem_cap_rows = max(128, (8 * 1024 * 1024 // (2 * row_bytes)) // 128 * 128)
    tile = min(tb, vmem_cap_rows, max(128, _round_up(pl.cdiv(b_eff, 2), 128)))
    if tile >= b_eff:
        tile = b_eff
    grid = (pl.cdiv(b_eff, tile),)

    out = pl.pallas_call(
        critic_kernel,
        out_shape=jax.ShapeDtypeStruct((b_eff, out_dim), jnp.float32),
        grid_spec=pltpu.PrefetchScalarGridSpec(
            num_scalar_prefetch=0,
            grid=grid,
            in_specs=[
                pl.BlockSpec((tile, in_dim), lambda i: (i, 0)),    # state stream
                pl.BlockSpec((tile, act_dim), lambda i: (i, 0)),   # action stream
                pl.BlockSpec((in_dim, LANE), lambda i: (0, 0)),    # weights stay
                pl.BlockSpec((act_dim, LANE), lambda i: (0, 0)),   #   VMEM-resident
                pl.BlockSpec((LANE, LANE), lambda i: (0, 0)),      #   (constant block
                pl.BlockSpec((LANE, out_dim), lambda i: (0, 0)),   #    index -> one DMA)
                pl.BlockSpec((2, LANE), lambda i: (0, 0)),
                pl.BlockSpec((1, out_dim), lambda i: (0, 0)),
            ],
            out_specs=pl.BlockSpec((tile, out_dim), lambda i: (i, 0)),
        ),
        compiler_params=pltpu.CompilerParams(
            dimension_semantics=("parallel",)),
    )(state, action, packed["ws"], packed["wa"], packed["w1"], packed["w2"],
      packed["b01"], packed["b2"])

    return out[:B] if b_eff != B else out


def reference_forward(state, action, p):
    h_s = jnp.maximum(state @ p["ws"] + p["bs"], 0.0)
    h_a = jnp.maximum(action @ p["wa"] + p["ba"], 0.0)
    h = jnp.concatenate([h_s, h_a], axis=1)
    h1 = jnp.maximum(h @ p["w1"] + p["b1"], 0.0)
    return h1 @ p["w2"] + p["b2"]


if __name__ == "__main__":
    batch, input_dim, output_dim = 2, 16, 4

    key = jax.random.PRNGKey(0)
    k_params, k_s1, k_a1, k_s2, k_a2 = jax.random.split(key, 5)

    raw = init_params(k_params, input_dim, output_dim)
    packed = pack_params(raw, input_dim, output_dim)

    # demo-scale case (B=2 -> single 8-row block, single grid step)
    state = jax.random.normal(k_s1, (batch, input_dim), jnp.float32)
    action = jax.random.normal(k_a1, (batch, output_dim), jnp.float32)
    out = jax.block_until_ready(critic_forward(state, action, packed))
    ref = reference_forward(state, action, raw)
    assert out.shape == (batch, output_dim)
    assert jnp.allclose(out, ref, atol=1e-4, rtol=1e-4)

    # exercise the multi-step grid + partial tail block path
    # (B=296 -> tile=256, grid=(2,), tail block has 40 valid rows, no pad op)
    b2 = 296
    state2 = jax.random.normal(k_s2, (b2, input_dim), jnp.float32)
    action2 = jax.random.normal(k_a2, (b2, output_dim), jnp.float32)
    out2 = jax.block_until_ready(critic_forward(state2, action2, packed))
    ref2 = reference_forward(state2, action2, raw)
    assert out2.shape == (b2, output_dim)
    assert jnp.allclose(out2, ref2, atol=1e-4, rtol=1e-4)

    print("KERNEL_OK")
</pallas_src>

<mosaic_0001>
module attributes {stable_mosaic.version = 11 : i64} {
  func.func @critic_kernel(%arg0: i32, %arg1: memref<8x16xf32, #tpu.memory_space<vmem>>, %arg2: memref<8x4xf32, #tpu.memory_space<vmem>>, %arg3: memref<16x128xf32, #tpu.memory_space<vmem>>, %arg4: memref<4x128xf32, #tpu.memory_space<vmem>>, %arg5: memref<128x128xf32, #tpu.memory_space<vmem>>, %arg6: memref<128x4xf32, #tpu.memory_space<vmem>>, %arg7: memref<2x128xf32, #tpu.memory_space<vmem>>, %arg8: memref<1x4xf32, #tpu.memory_space<vmem>>, %arg9: memref<8x4xf32, #tpu.memory_space<vmem>>) attributes {dimension_semantics = [#tpu.dimension_semantics<parallel>], iteration_bounds = array<i64: 1>, scalar_prefetch = 0 : i64, scratch_operands = 0 : i64, tpu.core_type = #tpu.core_type<tc>, window_params = [{transform_indices = @transform_0, window_bounds = array<i64: 8, 16>}, {transform_indices = @transform_1, window_bounds = array<i64: 8, 4>}, {pipeline_mode = #tpu.pipeline_mode<synchronous>, transform_indices = @transform_2, window_bounds = array<i64: 16, 128>}, {pipeline_mode = #tpu.pipeline_mode<synchronous>, transform_indices = @transform_3, window_bounds = array<i64: 4, 128>}, {pipeline_mode = #tpu.pipeline_mode<synchronous>, transform_indices = @transform_4, window_bounds = array<i64: 128, 128>}, {pipeline_mode = #tpu.pipeline_mode<synchronous>, transform_indices = @transform_5, window_bounds = array<i64: 128, 4>}, {pipeline_mode = #tpu.pipeline_mode<synchronous>, transform_indices = @transform_6, window_bounds = array<i64: 2, 128>}, {pipeline_mode = #tpu.pipeline_mode<synchronous>, transform_indices = @transform_7, window_bounds = array<i64: 1, 4>}, {transform_indices = @transform_8, window_bounds = array<i64: 8, 4>}]} {
    %c0 = arith.constant 0 : index
    %c0_0 = arith.constant 0 : index
    %0 = vector.load %arg1[%c0, %c0_0] : memref<8x16xf32, #tpu.memory_space<vmem>>, vector<8x16xf32>
    %c0_1 = arith.constant 0 : index
    %c0_2 = arith.constant 0 : index
    %1 = vector.load %arg3[%c0_1, %c0_2] : memref<16x128xf32, #tpu.memory_space<vmem>>, vector<16x128xf32>
    %cst = arith.constant dense<0.000000e+00> : vector<8x128xf32>
    %2 = tpu.matmul %0, %1, %cst {dimension_numbers = #tpu.dot_dimension_numbers<[1], [0], [0], [1], [0, 0, 1, 1], [], []>} : vector<8x16xf32>, vector<16x128xf32>, vector<8x128xf32> -> vector<8x128xf32>
    %c0_3 = arith.constant 0 : index
    %c0_4 = arith.constant 0 : index
    %3 = vector.load %arg2[%c0_3, %c0_4] : memref<8x4xf32, #tpu.memory_space<vmem>>, vector<8x4xf32>
    %c0_5 = arith.constant 0 : index
    %c0_6 = arith.constant 0 : index
    %4 = vector.load %arg4[%c0_5, %c0_6] : memref<4x128xf32, #tpu.memory_space<vmem>>, vector<4x128xf32>
    %cst_7 = arith.constant dense<0.000000e+00> : vector<8x128xf32>
    %5 = tpu.matmul %3, %4, %cst_7 {dimension_numbers = #tpu.dot_dimension_numbers<[1], [0], [0], [1], [0, 0, 1, 1], [], []>} : vector<8x4xf32>, vector<4x128xf32>, vector<8x128xf32> -> vector<8x128xf32>
    %6 = arith.addf %2, %5 : vector<8x128xf32>
    %c0_8 = arith.constant 0 : index
    %c0_9 = arith.constant 0 : index
    %7 = vector.load %arg7[%c0_8, %c0_9] : memref<2x128xf32, #tpu.memory_space<vmem>>, vector<1x128xf32>
    %8 = vector.broadcast %7 : vector<1x128xf32> to vector<8x128xf32>
    %9 = arith.addf %6, %8 : vector<8x128xf32>
    %cst_10 = arith.constant 0.000000e+00 : f32
    %10 = vector.broadcast %cst_10 : f32 to vector<8x128xf32>
    %11 = arith.maximumf %9, %10 : vector<8x128xf32>
    %c0_11 = arith.constant 0 : index
    %c0_12 = arith.constant 0 : index
    %12 = vector.load %arg5[%c0_11, %c0_12] : memref<128x128xf32, #tpu.memory_space<vmem>>, vector<128x128xf32>
    %cst_13 = arith.constant dense<0.000000e+00> : vector<8x128xf32>
    %13 = tpu.matmul %11, %12, %cst_13 {dimension_numbers = #tpu.dot_dimension_numbers<[1], [0], [0], [1], [0, 0, 1, 1], [], []>} : vector<8x128xf32>, vector<128x128xf32>, vector<8x128xf32> -> vector<8x128xf32>
    %c1 = arith.constant 1 : index
    %c0_14 = arith.constant 0 : index
    %14 = vector.load %arg7[%c1, %c0_14] : memref<2x128xf32, #tpu.memory_space<vmem>>, vector<1x128xf32>
    %15 = vector.broadcast %14 : vector<1x128xf32> to vector<8x128xf32>
    %16 = arith.addf %13, %15 : vector<8x128xf32>
    %cst_15 = arith.constant 0.000000e+00 : f32
    %17 = vector.broadcast %cst_15 : f32 to vector<8x128xf32>
    %18 = arith.maximumf %16, %17 : vector<8x128xf32>
    %c0_16 = arith.constant 0 : index
    %c0_17 = arith.constant 0 : index
    %19 = vector.load %arg6[%c0_16, %c0_17] : memref<128x4xf32, #tpu.memory_space<vmem>>, vector<128x4xf32>
    %cst_18 = arith.constant dense<0.000000e+00> : vector<8x4xf32>
    %20 = tpu.matmul %18, %19, %cst_18 {dimension_numbers = #tpu.dot_dimension_numbers<[1], [0], [0], [1], [0, 0, 1, 1], [], []>} : vector<8x128xf32>, vector<128x4xf32>, vector<8x4xf32> -> vector<8x4xf32>
    %c0_19 = arith.constant 0 : index
    %c0_20 = arith.constant 0 : index
    %21 = vector.load %arg8[%c0_19, %c0_20] : memref<1x4xf32, #tpu.memory_space<vmem>>, vector<1x4xf32>
    %22 = vector.broadcast %21 : vector<1x4xf32> to vector<8x4xf32>
    %23 = arith.addf %20, %22 : vector<8x4xf32>
    %c0_21 = arith.constant 0 : index
    %c0_22 = arith.constant 0 : index
    %24 = vector.load %arg9[%c0_21, %c0_22] : memref<8x4xf32, #tpu.memory_space<vmem>>, vector<8x4xf32>
    tpu.vector_store %arg9[%c0_21, %c0_22], %23 {strides = array<i32>} : memref<8x4xf32, #tpu.memory_space<vmem>>, vector<8x4xf32>,
    return
  }
  func.func @transform_0(%arg0: i32) -> (i32, i32) {
    %c0_i32 = arith.constant 0 : i32
    %c0_i32_0 = arith.constant 0 : i32
    return %arg0, %c0_i32 : i32, i32
  }
  func.func @transform_1(%arg0: i32) -> (i32, i32) {
    %c0_i32 = arith.constant 0 : i32
    %c0_i32_0 = arith.constant 0 : i32
    return %arg0, %c0_i32 : i32, i32
  }
  func.func @transform_2(%arg0: i32) -> (i32, i32) {
    %c0_i32 = arith.constant 0 : i32
    %c0_i32_0 = arith.constant 0 : i32
    %c0_i32_1 = arith.constant 0 : i32
    return %c0_i32, %c0_i32_0 : i32, i32
  }
  func.func @transform_3(%arg0: i32) -> (i32, i32) {
    %c0_i32 = arith.constant 0 : i32
    %c0_i32_0 = arith.constant 0 : i32
    %c0_i32_1 = arith.constant 0 : i32
    return %c0_i32, %c0_i32_0 : i32, i32
  }
  func.func @transform_4(%arg0: i32) -> (i32, i32) {
    %c0_i32 = arith.constant 0 : i32
    %c0_i32_0 = arith.constant 0 : i32
    %c0_i32_1 = arith.constant 0 : i32
    return %c0_i32, %c0_i32_0 : i32, i32
  }
  func.func @transform_5(%arg0: i32) -> (i32, i32) {
    %c0_i32 = arith.constant 0 : i32
    %c0_i32_0 = arith.constant 0 : i32
    %c0_i32_1 = arith.constant 0 : i32
    return %c0_i32, %c0_i32_0 : i32, i32
  }
  func.func @transform_6(%arg0: i32) -> (i32, i32) {
    %c0_i32 = arith.constant 0 : i32
    %c0_i32_0 = arith.constant 0 : i32
    %c0_i32_1 = arith.constant 0 : i32
    return %c0_i32, %c0_i32_0 : i32, i32
  }
  func.func @transform_7(%arg0: i32) -> (i32, i32) {
    %c0_i32 = arith.constant 0 : i32
    %c0_i32_0 = arith.constant 0 : i32
    %c0_i32_1 = arith.constant 0 : i32
    return %c0_i32, %c0_i32_0 : i32, i32
  }
  func.func @transform_8(%arg0: i32) -> (i32, i32) {
    %c0_i32 = arith.constant 0 : i32
    %c0_i32_0 = arith.constant 0 : i32
    return %arg0, %c0_i32 : i32, i32
  }
}

</mosaic_0001>

<bundles_post_ra>
// kernel: critic_forward.1
= control target key start
LH: loop header
LB: loop body
LE: loop exit
PB: predicated region body
PF: predicated region fallthrough
CT: control target
= control target key end

     0   :  { %vm38_vm0 = vcmask 1043456   ;;  %vm34_vm1 = vcmask 31744   ;;  %v512_v0 = vmov 0.0   ;;  %vm513_vm2 = vmmov 0   ;;  %s727_s3 = inlined_call_operand.vmem [shape: f32[4,128], index: 3, kind: input, shape index: {}]   ;;  %s728_s2 = inlined_call_operand.vmem [shape: f32[16,128], index: 2, kind: input, shape index: {}]   ;;  %s729_s1 = inlined_call_operand.vmem [shape: f32[8,4], index: 1, kind: input, shape index: {}]   ;;  %s730_s0 = inlined_call_operand.vmem [shape: f32[8,16], index: 0, kind: input, shape index: {}]   ;;  %s731_s4 = inlined_call_operand.vmem [shape: f32[128,128], index: 4, kind: input, shape index: {}]   ;;  %s732_s5 = inlined_call_operand.vmem [shape: f32[128,4], index: 5, kind: input, shape index: {}]   ;;  %s733_s6 = inlined_call_operand.vmem [shape: f32[2,128], index: 6, kind: input, shape index: {}]   ;;  %s734_s7 = inlined_call_operand.vmem [shape: f32[1,4], index: 7, kind: input, shape index: {}]   ;;  %s735_s8 = inlined_call_operand.vmem [shape: f32[8,4], index: 8, kind: output, shape index: {}]  }
   0x1   :  { %428 = vmatprep.subr.mxu0 %v512_v0  ;;  %433 = vmatprep.subr.mxu1 %v512_v0  ;;  %v33_v1 = vld [vmem:[%s727_s3] sm:$0xf]  ;;  %v31_v2 = vld [vmem:[%s728_s2 + $0x8] sm:$0xff]  ;;  %vm112_vm3 = vcmask 130048   ;;  %v208_v6 = vld [vmem:[%s731_s4 + $0x78] sm:$0xff] }
   0x2   :  { %v32_v3 = vld [vmem:[%s729_s1] sm:$0xff]  ;;  %429 = vmatpush3.msk.msra.mxu0 %vm38_vm0, %v33_v1  ;;  %430 = vmatprep.mubr.msk.f32.mxu0 %vm513_vm2, %v512_v0  ;;  %v207_v7 = vld [vmem:[%s731_s4 + $0x70] sm:$0xff]  ;;  %v206_v8 = vld [vmem:[%s731_s4 + $0x68] sm:$0xff] }
   0x3   :  { %v30_v4 = vld [vmem:[%s728_s2] sm:$0xff]  ;;  %434 = vmatpush3.msra.mxu1 %v31_v2  ;;  %431 = vmatmul.mubr.msk.f32.vlgmr.msra.gmra.mxu0 %vm34_vm1, %v32_v3  ;;  %v204_v10 = vld [vmem:[%s731_s4 + $0x58] sm:$0xff]  ;;  %v203_v11 = vld [vmem:[%s731_s4 + $0x50] sm:$0xff] }
   0x4   :  { %v29_v5 = vld [vmem:[%s730_s0] sm:$0xff]  ;;  %435 = vmatprep.subr.mxu1 %v512_v0  ;;  %437 = vmatprep.mubr.msk.f32.mxu1 %vm513_vm2, %v512_v0  ;;  %v202_v12 = vld [vmem:[%s731_s4 + $0x48] sm:$0xff]  ;;  %v200_v14 = vld [vmem:[%s731_s4 + $0x38] sm:$0xff] }
   0x5   :  { %436 = vmatpush3.msra.mxu1 %v30_v4  ;;  %440 = vmatprep.subr.mxu0 %v512_v0  ;;  %v205_v9 = vld [vmem:[%s731_s4 + $0x60] sm:$0xff]  ;;  %v199_v15 = vld [vmem:[%s731_s4 + $0x30] sm:$0xff]  ;;  %v198_v16 = vld [vmem:[%s731_s4 + $0x28] sm:$0xff] }
   0x6   :  { %438 = vmatmul.mubr.msk.f32.vlgmr.msra.gmra.mxu1 %vm112_vm3, %v29_v5  ;;  %441 = vmatpush3.msra.mxu0 %v208_v6  ;;  %v201_v13 = vld [vmem:[%s731_s4 + $0x40] sm:$0xff]  ;;  %v196_v18 = vld [vmem:[%s731_s4 + $0x18] sm:$0xff]  ;;  %v195_v19 = vld [vmem:[%s731_s4 + $0x10] sm:$0xff] }
   0x7   :  { %442 = vmatprep.subr.mxu0 %v512_v0  ;;  %472 = vmatprep.mubr.msk.f32.mxu0 %vm513_vm2, %v512_v0  ;;  %v197_v17 = vld [vmem:[%s731_s4 + $0x20] sm:$0xff]  ;;  %v194_v20 = vld [vmem:[%s731_s4 + $0x8] sm:$0xff]  ;;  %v300_v22 = vld [vmem:[%s732_s5 + $0x78] sm:$0xff] }
   0x8   :  { %443 = vmatpush3.msra.mxu0 %v207_v7  ;;  %475 = vmatprep.subr.mxu1 %v512_v0  ;;  %v193_v21 = vld [vmem:[%s731_s4] sm:$0xff]  ;;  %v299_v23 = vld [vmem:[%s732_s5 + $0x70] sm:$0xff]  ;;  %v298_v24 = vld [vmem:[%s732_s5 + $0x68] sm:$0xff] }
   0x9   :  { %444 = vmatprep.subr.mxu0 %v512_v0  ;;  %507 = vmatprep.mubr.msk.f32.mxu1 %vm513_vm2, %v512_v0  ;;  %v297_v25 = vld [vmem:[%s732_s5 + $0x60] sm:$0xff]  ;;  %v296_v26 = vld [vmem:[%s732_s5 + $0x58] sm:$0xff]  ;;  %v295_v27 = vld [vmem:[%s732_s5 + $0x50] sm:$0xff] }
   0xa   :  { %445 = vmatpush3.msra.mxu0 %v206_v8  ;;  %476 = vmatpush3.msra.mxu1 %v300_v22  ;;  %v294_v28 = vld [vmem:[%s732_s5 + $0x48] sm:$0xff]  ;;  %v293_v29 = vld [vmem:[%s732_s5 + $0x40] sm:$0xff]  ;;  %v292_v30 = vld [vmem:[%s732_s5 + $0x38] sm:$0xff] }
   0xb   :  { %446 = vmatprep.subr.mxu0 %v512_v0  ;;  %477 = vmatprep.subr.mxu1 %v512_v0  ;;  %v291_v31 = vld [vmem:[%s732_s5 + $0x30] sm:$0xff]  ;;  %v290_v32 = vld [vmem:[%s732_s5 + $0x28] sm:$0xff]  ;;  %v289_v33 = vld [vmem:[%s732_s5 + $0x20] sm:$0xff] }
   0xc   :  { %447 = vmatpush3.msra.mxu0 %v205_v9  ;;  %478 = vmatpush3.msra.mxu1 %v299_v23  ;;  %v288_v34 = vld [vmem:[%s732_s5 + $0x18] sm:$0xff]  ;;  %v386_v38 = vld [vmem:[%s733_s6] ss:$0 sm:$0xff]  ;;  %v287_v43 = vld [vmem:[%s732_s5 + $0x10] sm:$0xff] }
   0xd   :  { %448 = vmatprep.subr.mxu0 %v512_v0  ;;  %479 = vmatprep.subr.mxu1 %v512_v0  ;;  %v286_v44 = vld [vmem:[%s732_s5 + $0x8] sm:$0xff]  ;;  %v285_v45 = vld [vmem:[%s732_s5] sm:$0xff] }
   0xe   :  { %449 = vmatpush3.msra.mxu0 %v204_v10  ;;  %480 = vmatpush3.msra.mxu1 %v298_v24  ;;  %v387_v46 = vld [vmem:[%s733_s6 + $0x1] ss:$0 sm:$0xff]  ;;  %v388_v51 = vld [vmem:[%s734_s7] ss:$0 sm:$0xff] }
   0xf   :  { %450 = vmatprep.subr.mxu0 %v512_v0  ;;  %481 = vmatprep.subr.mxu1 %v512_v0 }
  0x10   :  { %451 = vmatpush3.msra.mxu0 %v203_v11  ;;  %482 = vmatpush3.msra.mxu1 %v297_v25 }
  0x11   :  { %452 = vmatprep.subr.mxu0 %v512_v0  ;;  %483 = vmatprep.subr.mxu1 %v512_v0 }
  0x12   :  { %453 = vmatpush3.msra.mxu0 %v202_v12  ;;  %484 = vmatpush3.msra.mxu1 %v296_v26 }
  0x13   :  { %454 = vmatprep.subr.mxu0 %v512_v0  ;;  %485 = vmatprep.subr.mxu1 %v512_v0 }
  0x14   :  { %455 = vmatpush3.msra.mxu0 %v201_v13  ;;  %486 = vmatpush3.msra.mxu1 %v295_v27 }
  0x15   :  { %456 = vmatprep.subr.mxu0 %v512_v0  ;;  %487 = vmatprep.subr.mxu1 %v512_v0 }
  0x16   :  { %457 = vmatpush3.msra.mxu0 %v200_v14  ;;  %488 = vmatpush3.msra.mxu1 %v294_v28 }
  0x17   :  { %458 = vmatprep.subr.mxu0 %v512_v0  ;;  %489 = vmatprep.subr.mxu1 %v512_v0 }
  0x18   :  { %459 = vmatpush3.msra.mxu0 %v199_v15  ;;  %490 = vmatpush3.msra.mxu1 %v293_v29 }
  0x19   :  { %460 = vmatprep.subr.mxu0 %v512_v0  ;;  %491 = vmatprep.subr.mxu1 %v512_v0 }
  0x1a   :  { %461 = vmatpush3.msra.mxu0 %v198_v16  ;;  %492 = vmatpush3.msra.mxu1 %v292_v30 }
  0x1b   :  { %462 = vmatprep.subr.mxu0 %v512_v0  ;;  %493 = vmatprep.subr.mxu1 %v512_v0 }
  0x1c   :  { %463 = vmatpush3.msra.mxu0 %v197_v17  ;;  %494 = vmatpush3.msra.mxu1 %v291_v31 }
  0x1d   :  { %464 = vmatprep.subr.mxu0 %v512_v0  ;;  %495 = vmatprep.subr.mxu1 %v512_v0 }
  0x1e   :  { %465 = vmatpush3.msra.mxu0 %v196_v18  ;;  %496 = vmatpush3.msra.mxu1 %v290_v32 }
  0x1f   :  { %466 = vmatprep.subr.mxu0 %v512_v0  ;;  %497 = vmatprep.subr.mxu1 %v512_v0 }
  0x20   :  { %467 = vmatpush3.msra.mxu0 %v195_v19  ;;  %498 = vmatpush3.msra.mxu1 %v289_v33 }
  0x21   :  { %468 = vmatprep.subr.mxu0 %v512_v0  ;;  %499 = vmatprep.subr.mxu1 %v512_v0 }
  0x22   :  { %469 = vmatpush3.msra.mxu0 %v194_v20  ;;  %500 = vmatpush3.msra.mxu1 %v288_v34 }
  0x23   :  { %470 = vmatprep.subr.mxu0 %v512_v0  ;;  %501 = vmatprep.subr.mxu1 %v512_v0 }
  0x24   :  { %471 = vmatpush3.msra.mxu0 %v193_v21  ;;  %502 = vmatpush3.msra.mxu1 %v287_v43 }
  0x25   :  { %503 = vmatprep.subr.mxu1 %v512_v0 }
  0x26   :  { %504 = vmatpush3.msra.mxu1 %v286_v44 }
  0x27   :  { %505 = vmatprep.subr.mxu1 %v512_v0 }
  0x28   :  { %506 = vmatpush3.msra.mxu1 %v285_v45 }
  0xc3   :  { %v108_v35 = vpop.f32.mrf.mxu0 }
  0xc5   :  { %v432_v36 = vpop.f32.mrf.mxu0 }
  0xc6   :  { %v182_v37 = vpop.f32.mrf.mxu1 }
  0xc7   :  { %v183_v39 = vadd.f32 %v182_v37, %v108_v35 }
  0xc8   :  { %v439_v40 = vpop.f32.mrf.mxu1 }
  0xc9   :  { %v191_v41 = vadd.f32 %v386_v38, %v183_v39 }
  0xcb   :  { %v192_v42 = vmax.f32 %v191_v41, 0.0 }
  0xcd   :  { %473 = vmatmul.mubr.f32.vlgmr.msra.gmra.mxu0 %v192_v42 }
 0x18d   :  { %v280_v47 = vpop.f32.mrf.mxu0 }
 0x18e   :  { %v281_v48 = vadd.f32 %v387_v46, %v280_v47 }
 0x18f   :  { %v474_v49 = vpop.f32.mrf.mxu0 }
 0x190   :  { %v284_v50 = vmax.f32 %v281_v48, 0.0 }
 0x192   :  { %508 = vmatmul.mubr.f32.vlgmr.msra.gmra.mxu1 %v284_v50 }
 0x252   :  { %v374_v52 = vpop.f32.mrf.mxu1 }
 0x253   :  { %v375_v53 = vadd.f32 %v388_v51, %v374_v52 }
 0x254   :  { %v509_v54 = vpop.f32.mrf.mxu1 }
 0x255   :  { %378 = vst.msk [vmem:[%s735_s8] sm:$0xff] %vm34_vm1, %v375_v53 }

</bundles_post_ra>
